<compile_context>
chip_gen: v7x
topology: tpu7x:2x2x1
jax: 0.10.0
libtpu: 0.0.40
codegen_flags: <defaults>
</compile_context>

<pallas_src>
import functools

import jax
import jax.numpy as jnp
import numpy as np
from jax import lax
from jax.experimental import pallas as pl
from jax.experimental.pallas import tpu as pltpu


def _multibox_loss_kernel(conf_ref, pred_ref, lab_ref, gt_ref,
                          sl1_ref, cls_ref, npos_ref, *, neg_pos_ratio):
    C, P = conf_ref.shape
    conf = conf_ref[...].astype(jnp.float32)      # (C, P)  classes on sublanes
    lab = lab_ref[...]                            # (1, P)  int32
    pred = pred_ref[...].astype(jnp.float32)      # (4, P)
    gt = gt_ref[...].astype(jnp.float32)          # (4, P)

    # ---- background loss = -log_softmax(conf)[class 0]  (lane dense) -------
    m = jnp.max(conf, axis=0, keepdims=True)                          # (1, P)
    lse = m + jnp.log(jnp.sum(jnp.exp(conf - m), axis=0, keepdims=True))
    bg_loss = lse - conf[0:1, :]                                      # (1, P)

    # ---- hard negative mining ----------------------------------------------
    pos = lab > 0                                                     # (1, P)
    pos_f = pos.astype(jnp.float32)
    num_pos = jnp.sum(pos_f, axis=1, keepdims=True)                   # (1, 1)
    num_neg = num_pos * float(neg_pos_ratio)                          # (1, 1)

    # Positives get a large finite sentinel so they never rank as negatives.
    masked_row = jnp.where(pos, -1e30, bg_loss)                       # (1, P)
    row_mat = jnp.broadcast_to(masked_row, (P, P))        # [j, i] -> loss[i]
    col_mat = jnp.transpose(row_mat)                      # [j, i] -> loss[j]
    # (transpose is pure data movement -> bit-exact ties vs. the row values)

    # TODO(synk): torch.sort has no Mosaic lowering; the descending stable
    # rank is computed by O(P^2) pairwise counting.  For real SSD prior counts
    # (P ~ 8732) replace this with a threshold/bisection top-k or tile over P.
    j_idx = lax.broadcasted_iota(jnp.int32, (P, P), 0)    # sublane index j
    i_idx = lax.broadcasted_iota(jnp.int32, (P, P), 1)    # lane index i
    beats = ((col_mat > row_mat) |
             ((col_mat == row_mat) & (j_idx < i_idx))).astype(jnp.bfloat16)
    # rank[i] = #{j that sort strictly before i in a stable descending sort};
    # contract j on the MXU: bf16 0/1 operands + f32 accumulation are exact.
    ones_lhs = jnp.ones((16, P), jnp.bfloat16)
    rank = jnp.dot(ones_lhs, beats,
                   preferred_element_type=jnp.float32)[0:1, :]        # (1, P)

    neg = rank < num_neg                                              # (1, P)
    mask = pos | neg                                                  # (1, P)

    # ---- classification loss: sum of cross-entropy over selected priors ----
    cls_iota = lax.broadcasted_iota(jnp.int32, (C, P), 0)             # (C, P)
    onehot = (cls_iota == lab).astype(jnp.float32)                    # (C, P)
    conf_at_lab = jnp.sum(conf * onehot, axis=0, keepdims=True)       # (1, P)
    ce = lse - conf_at_lab                                            # (1, P)
    cls_sum = jnp.sum(jnp.where(mask, ce, 0.0), axis=1, keepdims=True)

    # ---- smooth L1 over positive priors -------------------------------------
    d = pred - gt
    ad = jnp.abs(d)
    per = jnp.where(ad < 1.0, 0.5 * d * d, ad - 0.5)                  # (4, P)
    per_prior = jnp.sum(per, axis=0, keepdims=True) * pos_f           # (1, P)
    sl1_sum = jnp.sum(per_prior, axis=1, keepdims=True)               # (1, 1)

    # Lane-broadcast the per-batch partial sums into lane-dense output rows.
    sl1_ref[...] = jnp.broadcast_to(sl1_sum, sl1_ref.shape)
    cls_ref[...] = jnp.broadcast_to(cls_sum, cls_ref.shape)
    npos_ref[...] = jnp.broadcast_to(num_pos, npos_ref.shape)


@functools.partial(jax.jit, static_argnames=("neg_pos_ratio",))
def multibox_loss(confidence, predicted_locations, labels, gt_locations,
                  neg_pos_ratio=3):
    """Returns (smooth_l1_loss / num_pos, classification_loss / num_pos)."""
    B, P, C = confidence.shape

    # Lane-dense layouts: priors on the lane axis.
    conf_t = jnp.transpose(confidence, (0, 2, 1))           # (B, C, P)
    pred_t = jnp.transpose(predicted_locations, (0, 2, 1))  # (B, 4, P)
    gt_t = jnp.transpose(gt_locations, (0, 2, 1))           # (B, 4, P)
    lab_t = labels.astype(jnp.int32).reshape(B, 1, P)       # (B, 1, P)

    kernel = functools.partial(_multibox_loss_kernel,
                               neg_pos_ratio=neg_pos_ratio)
    part_shape = jax.ShapeDtypeStruct((B, 1, 128), jnp.float32)
    out_spec = pl.BlockSpec((None, 1, 128), lambda b: (b, 0, 0))

    sl1_p, cls_p, npos_p = pl.pallas_call(
        kernel,
        out_shape=(part_shape, part_shape, part_shape),
        grid=(B,),
        in_specs=[
            pl.BlockSpec((None, C, P), lambda b: (b, 0, 0)),
            pl.BlockSpec((None, 4, P), lambda b: (b, 0, 0)),
            pl.BlockSpec((None, 1, P), lambda b: (b, 0, 0)),
            pl.BlockSpec((None, 4, P), lambda b: (b, 0, 0)),
        ],
        out_specs=(out_spec, out_spec, out_spec),
        compiler_params=pltpu.CompilerParams(
            dimension_semantics=("parallel",)),
    )(conf_t, pred_t, lab_t, gt_t)

    # Combine per-batch partials (matches PyTorch: divide by total positives).
    npos = jnp.sum(npos_p[:, 0, 0])
    sl1 = jnp.sum(sl1_p[:, 0, 0]) / npos
    cls = jnp.sum(cls_p[:, 0, 0]) / npos
    return sl1, cls


def _reference(confidence, predicted_locations, labels, gt_locations,
               neg_pos_ratio=3):
    """Pure-JAX mirror of the PyTorch module (argsort-based mining)."""
    lse = jax.scipy.special.logsumexp(confidence, axis=2)
    loss = lse - confidence[:, :, 0]          # -log_softmax(...)[:, :, 0]
    pos_mask = labels > 0
    num_pos = pos_mask.sum(axis=1, keepdims=True)
    num_neg = num_pos * neg_pos_ratio
    loss = jnp.where(pos_mask, -jnp.inf, loss)
    indexes = jnp.argsort(-loss, axis=1)      # descending, stable
    orders = jnp.argsort(indexes, axis=1)
    neg_mask = orders < num_neg
    mask = pos_mask | neg_mask

    picked = jnp.take_along_axis(confidence, labels[..., None], axis=2)[..., 0]
    ce = lse - picked
    cls_loss = jnp.sum(jnp.where(mask, ce, 0.0))

    d = predicted_locations - gt_locations
    ad = jnp.abs(d)
    per = jnp.where(ad < 1.0, 0.5 * d * d, ad - 0.5)
    sl1 = jnp.sum(per * pos_mask[..., None])
    npos = jnp.sum(pos_mask).astype(jnp.float32)
    return sl1 / npos, cls_loss / npos


if __name__ == "__main__":
    key = jax.random.PRNGKey(0)
    B, P, C = 2, 256, 8            # batch, num_priors, num_classes
    k1, k2, k3, k4, k5 = jax.random.split(key, 5)

    confidence = jax.random.normal(k1, (B, P, C), jnp.float32)
    predicted = jax.random.normal(k2, (B, P, 4), jnp.float32)
    gt_locations = jax.random.normal(k3, (B, P, 4), jnp.float32)
    is_pos = jax.random.uniform(k4, (B, P)) < 0.15
    cls_ids = jax.random.randint(k5, (B, P), 1, C)
    labels = jnp.where(is_pos, cls_ids, 0).astype(jnp.int32)

    sl1, cls_loss = multibox_loss(confidence, predicted, labels, gt_locations,
                                  neg_pos_ratio=3)
    jax.block_until_ready((sl1, cls_loss))

    ref_sl1, ref_cls = _reference(confidence, predicted, labels, gt_locations,
                                  neg_pos_ratio=3)
    np.testing.assert_allclose(np.asarray(sl1), np.asarray(ref_sl1),
                               rtol=1e-4, atol=1e-4)
    np.testing.assert_allclose(np.asarray(cls_loss), np.asarray(ref_cls),
                               rtol=1e-4, atol=1e-4)
    print("KERNEL_OK")
</pallas_src>

<mosaic_0001>
module attributes {stable_mosaic.version = 11 : i64} {
  func.func @_multibox_loss_kernel(%arg0: i32, %arg1: memref<1x8x256xf32, #tpu.memory_space<vmem>>, %arg2: memref<1x4x256xf32, #tpu.memory_space<vmem>>, %arg3: memref<1x1x256xi32, #tpu.memory_space<vmem>>, %arg4: memref<1x4x256xf32, #tpu.memory_space<vmem>>, %arg5: memref<1x1x128xf32, #tpu.memory_space<vmem>>, %arg6: memref<1x1x128xf32, #tpu.memory_space<vmem>>, %arg7: memref<1x1x128xf32, #tpu.memory_space<vmem>>) attributes {dimension_semantics = [#tpu.dimension_semantics<parallel>], iteration_bounds = array<i64: 2>, scalar_prefetch = 0 : i64, scratch_operands = 0 : i64, tpu.core_type = #tpu.core_type<tc>, window_params = [{transform_indices = @transform_0, window_bounds = array<i64: 1, 8, 256>}, {transform_indices = @transform_1, window_bounds = array<i64: 1, 4, 256>}, {transform_indices = @transform_2, window_bounds = array<i64: 1, 1, 256>}, {transform_indices = @transform_3, window_bounds = array<i64: 1, 4, 256>}, {transform_indices = @transform_4, window_bounds = array<i64: 1, 1, 128>}, {transform_indices = @transform_5, window_bounds = array<i64: 1, 1, 128>}, {transform_indices = @transform_6, window_bounds = array<i64: 1, 1, 128>}]} {
    %c0 = arith.constant 0 : index
    %c0_0 = arith.constant 0 : index
    %c0_1 = arith.constant 0 : index
    %0 = vector.load %arg1[%c0, %c0_0, %c0_1] : memref<1x8x256xf32, #tpu.memory_space<vmem>>, vector<1x8x256xf32>
    %1 = vector.shape_cast %0 : vector<1x8x256xf32> to vector<8x256xf32>
    %c0_2 = arith.constant 0 : index
    %c0_3 = arith.constant 0 : index
    %c0_4 = arith.constant 0 : index
    %2 = vector.load %arg3[%c0_2, %c0_3, %c0_4] : memref<1x1x256xi32, #tpu.memory_space<vmem>>, vector<1x1x256xi32>
    %3 = vector.shape_cast %2 : vector<1x1x256xi32> to vector<1x256xi32>
    %c0_5 = arith.constant 0 : index
    %c0_6 = arith.constant 0 : index
    %c0_7 = arith.constant 0 : index
    %4 = vector.load %arg2[%c0_5, %c0_6, %c0_7] : memref<1x4x256xf32, #tpu.memory_space<vmem>>, vector<1x4x256xf32>
    %5 = vector.shape_cast %4 : vector<1x4x256xf32> to vector<4x256xf32>
    %c0_8 = arith.constant 0 : index
    %c0_9 = arith.constant 0 : index
    %c0_10 = arith.constant 0 : index
    %6 = vector.load %arg4[%c0_8, %c0_9, %c0_10] : memref<1x4x256xf32, #tpu.memory_space<vmem>>, vector<1x4x256xf32>
    %7 = vector.shape_cast %6 : vector<1x4x256xf32> to vector<4x256xf32>
    %cst = arith.constant dense<0xFF800000> : vector<256xf32>
    %8 = vector.multi_reduction <maximumf>, %1, %cst [0] : vector<8x256xf32> to vector<256xf32>
    %9 = vector.shape_cast %8 : vector<256xf32> to vector<1x256xf32>
    %10 = vector.broadcast %9 : vector<1x256xf32> to vector<8x256xf32>
    %11 = arith.subf %1, %10 : vector<8x256xf32>
    %12 = math.exp %11 : vector<8x256xf32>
    %cst_11 = arith.constant dense<0.000000e+00> : vector<256xf32>
    %13 = vector.multi_reduction <add>, %12, %cst_11 [0] : vector<8x256xf32> to vector<256xf32>
    %14 = vector.shape_cast %13 : vector<256xf32> to vector<1x256xf32>
    %15 = math.log %14 : vector<1x256xf32>
    %16 = arith.addf %9, %15 : vector<1x256xf32>
    %17 = vector.extract_strided_slice %1 {offsets = [0, 0], sizes = [1, 256], strides = [1, 1]} : vector<8x256xf32> to vector<1x256xf32>
    %18 = arith.subf %16, %17 : vector<1x256xf32>
    %c0_i32 = arith.constant 0 : i32
    %19 = vector.broadcast %c0_i32 : i32 to vector<1x256xi32>
    %20 = arith.cmpi sgt, %3, %19 : vector<1x256xi32>
    %21 = arith.extui %20 : vector<1x256xi1> to vector<1x256xi32>
    %22 = arith.sitofp %21 : vector<1x256xi32> to vector<1x256xf32>
    %cst_12 = arith.constant dense<0.000000e+00> : vector<1xf32>
    %23 = vector.multi_reduction <add>, %22, %cst_12 [1] : vector<1x256xf32> to vector<1xf32>
    %24 = vector.shape_cast %23 : vector<1xf32> to vector<1x1xf32>
    %cst_13 = arith.constant 3.000000e+00 : f32
    %25 = vector.broadcast %cst_13 : f32 to vector<1x1xf32>
    %26 = arith.mulf %24, %25 : vector<1x1xf32>
    %cst_14 = arith.constant -1.000000e+30 : f32
    %27 = vector.broadcast %cst_14 : f32 to vector<1x256xf32>
    %28 = arith.select %20, %27, %18 : vector<1x256xi1>, vector<1x256xf32>
    %29 = vector.shape_cast %28 : vector<1x256xf32> to vector<1x256xf32>
    %30 = vector.broadcast %29 : vector<1x256xf32> to vector<256x256xf32>
    %31 = tpu.transpose %30, [1, 0] : vector<256x256xf32> -> vector<256x256xf32>
    %32 = tpu.iota {dimensions = array<i32: 0>} : vector<256x256xi32>
    %33 = tpu.iota {dimensions = array<i32: 1>} : vector<256x256xi32>
    %34 = arith.cmpf ogt, %31, %30 : vector<256x256xf32>
    %35 = arith.cmpf oeq, %31, %30 : vector<256x256xf32>
    %36 = arith.cmpi slt, %32, %33 : vector<256x256xi32>
    %37 = arith.andi %35, %36 : vector<256x256xi1>
    %38 = arith.ori %34, %37 : vector<256x256xi1>
    %39 = arith.extui %38 : vector<256x256xi1> to vector<256x256xi32>
    %40 = arith.sitofp %39 : vector<256x256xi32> to vector<256x256xf32>
    %41 = arith.truncf %40 : vector<256x256xf32> to vector<256x256xbf16>
    %cst_15 = arith.constant 1.000000e+00 : bf16
    %42 = vector.broadcast %cst_15 : bf16 to vector<16x256xbf16>
    %cst_16 = arith.constant dense<0.000000e+00> : vector<16x256xf32>
    %43 = tpu.matmul %42, %41, %cst_16 {dimension_numbers = #tpu.dot_dimension_numbers<[1], [0], [0], [1], [0, 0, 1, 1], [], []>} : vector<16x256xbf16>, vector<256x256xbf16>, vector<16x256xf32> -> vector<16x256xf32>
    %44 = vector.extract_strided_slice %43 {offsets = [0, 0], sizes = [1, 256], strides = [1, 1]} : vector<16x256xf32> to vector<1x256xf32>
    %45 = vector.broadcast %26 : vector<1x1xf32> to vector<1x256xf32>
    %46 = arith.cmpf olt, %44, %45 : vector<1x256xf32>
    %47 = arith.ori %20, %46 : vector<1x256xi1>
    %48 = tpu.iota {dimensions = array<i32: 0>} : vector<8x256xi32>
    %49 = vector.broadcast %3 : vector<1x256xi32> to vector<8x256xi32>
    %50 = arith.cmpi eq, %48, %49 : vector<8x256xi32>
    %51 = arith.extui %50 : vector<8x256xi1> to vector<8x256xi32>
    %52 = arith.sitofp %51 : vector<8x256xi32> to vector<8x256xf32>
    %53 = arith.mulf %1, %52 : vector<8x256xf32>
    %cst_17 = arith.constant dense<0.000000e+00> : vector<256xf32>
    %54 = vector.multi_reduction <add>, %53, %cst_17 [0] : vector<8x256xf32> to vector<256xf32>
    %55 = vector.shape_cast %54 : vector<256xf32> to vector<1x256xf32>
    %56 = arith.subf %16, %55 : vector<1x256xf32>
    %cst_18 = arith.constant 0.000000e+00 : f32
    %57 = vector.broadcast %cst_18 : f32 to vector<1x256xf32>
    %58 = arith.select %47, %56, %57 : vector<1x256xi1>, vector<1x256xf32>
    %cst_19 = arith.constant dense<0.000000e+00> : vector<1xf32>
    %59 = vector.multi_reduction <add>, %58, %cst_19 [1] : vector<1x256xf32> to vector<1xf32>
    %60 = vector.shape_cast %59 : vector<1xf32> to vector<1x1xf32>
    %61 = arith.subf %5, %7 : vector<4x256xf32>
    %62 = math.absf %61 : vector<4x256xf32>
    %cst_20 = arith.constant 1.000000e+00 : f32
    %63 = vector.broadcast %cst_20 : f32 to vector<4x256xf32>
    %64 = arith.cmpf olt, %62, %63 : vector<4x256xf32>
    %cst_21 = arith.constant 5.000000e-01 : f32
    %65 = vector.broadcast %cst_21 : f32 to vector<4x256xf32>
    %66 = arith.mulf %65, %61 : vector<4x256xf32>
    %67 = arith.mulf %66, %61 : vector<4x256xf32>
    %cst_22 = arith.constant 5.000000e-01 : f32
    %68 = vector.broadcast %cst_22 : f32 to vector<4x256xf32>
    %69 = arith.subf %62, %68 : vector<4x256xf32>
    %70 = arith.select %64, %67, %69 : vector<4x256xi1>, vector<4x256xf32>
    %cst_23 = arith.constant dense<0.000000e+00> : vector<256xf32>
    %71 = vector.multi_reduction <add>, %70, %cst_23 [0] : vector<4x256xf32> to vector<256xf32>
    %72 = vector.shape_cast %71 : vector<256xf32> to vector<1x256xf32>
    %73 = arith.mulf %72, %22 : vector<1x256xf32>
    %cst_24 = arith.constant dense<0.000000e+00> : vector<1xf32>
    %74 = vector.multi_reduction <add>, %73, %cst_24 [1] : vector<1x256xf32> to vector<1xf32>
    %75 = vector.shape_cast %74 : vector<1xf32> to vector<1x1xf32>
    %76 = vector.shape_cast %75 : vector<1x1xf32> to vector<1x1xf32>
    %77 = vector.broadcast %76 : vector<1x1xf32> to vector<1x128xf32>
    %c0_25 = arith.constant 0 : index
    %c0_26 = arith.constant 0 : index
    %c0_27 = arith.constant 0 : index
    %78 = vector.load %arg5[%c0_25, %c0_26, %c0_27] : memref<1x1x128xf32, #tpu.memory_space<vmem>>, vector<1x1x128xf32>
    %79 = vector.shape_cast %78 : vector<1x1x128xf32> to vector<1x128xf32>
    %80 = vector.shape_cast %77 : vector<1x128xf32> to vector<1x1x128xf32>
    tpu.vector_store %arg5[%c0_25, %c0_26, %c0_27], %80 {strides = array<i32>} : memref<1x1x128xf32, #tpu.memory_space<vmem>>, vector<1x1x128xf32>,
    %81 = vector.shape_cast %60 : vector<1x1xf32> to vector<1x1xf32>
    %82 = vector.broadcast %81 : vector<1x1xf32> to vector<1x128xf32>
    %c0_28 = arith.constant 0 : index
    %c0_29 = arith.constant 0 : index
    %c0_30 = arith.constant 0 : index
    %83 = vector.load %arg6[%c0_28, %c0_29, %c0_30] : memref<1x1x128xf32, #tpu.memory_space<vmem>>, vector<1x1x128xf32>
    %84 = vector.shape_cast %83 : vector<1x1x128xf32> to vector<1x128xf32>
    %85 = vector.shape_cast %82 : vector<1x128xf32> to vector<1x1x128xf32>
    tpu.vector_store %arg6[%c0_28, %c0_29, %c0_30], %85 {strides = array<i32>} : memref<1x1x128xf32, #tpu.memory_space<vmem>>, vector<1x1x128xf32>,
    %86 = vector.shape_cast %24 : vector<1x1xf32> to vector<1x1xf32>
    %87 = vector.broadcast %86 : vector<1x1xf32> to vector<1x128xf32>
    %c0_31 = arith.constant 0 : index
    %c0_32 = arith.constant 0 : index
    %c0_33 = arith.constant 0 : index
    %88 = vector.load %arg7[%c0_31, %c0_32, %c0_33] : memref<1x1x128xf32, #tpu.memory_space<vmem>>, vector<1x1x128xf32>
    %89 = vector.shape_cast %88 : vector<1x1x128xf32> to vector<1x128xf32>
    %90 = vector.shape_cast %87 : vector<1x128xf32> to vector<1x1x128xf32>
    tpu.vector_store %arg7[%c0_31, %c0_32, %c0_33], %90 {strides = array<i32>} : memref<1x1x128xf32, #tpu.memory_space<vmem>>, vector<1x1x128xf32>,
    return
  }
  func.func @transform_0(%arg0: i32) -> (i32, i32, i32) {
    %c0_i32 = arith.constant 0 : i32
    %c0_i32_0 = arith.constant 0 : i32
    %c0_i32_1 = arith.constant 0 : i32
    return %arg0, %c0_i32, %c0_i32_0 : i32, i32, i32
  }
  func.func @transform_1(%arg0: i32) -> (i32, i32, i32) {
    %c0_i32 = arith.constant 0 : i32
    %c0_i32_0 = arith.constant 0 : i32
    %c0_i32_1 = arith.constant 0 : i32
    return %arg0, %c0_i32, %c0_i32_0 : i32, i32, i32
  }
  func.func @transform_2(%arg0: i32) -> (i32, i32, i32) {
    %c0_i32 = arith.constant 0 : i32
    %c0_i32_0 = arith.constant 0 : i32
    %c0_i32_1 = arith.constant 0 : i32
    return %arg0, %c0_i32, %c0_i32_0 : i32, i32, i32
  }
  func.func @transform_3(%arg0: i32) -> (i32, i32, i32) {
    %c0_i32 = arith.constant 0 : i32
    %c0_i32_0 = arith.constant 0 : i32
    %c0_i32_1 = arith.constant 0 : i32
    return %arg0, %c0_i32, %c0_i32_0 : i32, i32, i32
  }
  func.func @transform_4(%arg0: i32) -> (i32, i32, i32) {
    %c0_i32 = arith.constant 0 : i32
    %c0_i32_0 = arith.constant 0 : i32
    %c0_i32_1 = arith.constant 0 : i32
    return %arg0, %c0_i32, %c0_i32_0 : i32, i32, i32
  }
  func.func @transform_5(%arg0: i32) -> (i32, i32, i32) {
    %c0_i32 = arith.constant 0 : i32
    %c0_i32_0 = arith.constant 0 : i32
    %c0_i32_1 = arith.constant 0 : i32
    return %arg0, %c0_i32, %c0_i32_0 : i32, i32, i32
  }
  func.func @transform_6(%arg0: i32) -> (i32, i32, i32) {
    %c0_i32 = arith.constant 0 : i32
    %c0_i32_0 = arith.constant 0 : i32
    %c0_i32_1 = arith.constant 0 : i32
    return %arg0, %c0_i32, %c0_i32_0 : i32, i32, i32
  }
}

</mosaic_0001>

<bundles_post_ra>
// kernel: multibox_loss.1
= control target key start
LH: loop header
LB: loop body
LE: loop exit
PB: predicated region body
PF: predicated region fallthrough
CT: control target
= control target key end

     0   :  { %12 = vsyncpa [#allocation3], 0  ;;  %s2424_s0 = inlined_call_operand.hbm [shape: f32[2,8,256], index: 0, kind: input, shape index: {}]   ;;  %s2425_s1 = inlined_call_operand.vmem [shape: f32[2,4,256], index: 1, kind: input, shape index: {}]   ;;  %s2426_s2 = inlined_call_operand.vmem [shape: s32[2,1,256], index: 2, kind: input, shape index: {}]   ;;  %s2427_s3 = inlined_call_operand.hbm [shape: f32[2,4,256], index: 3, kind: input, shape index: {}]   ;;  %s2428_s4 = inlined_call_operand.vmem [shape: f32[2,1,128], index: 4, kind: output, shape index: {0}]   ;;  %s2429_s5 = inlined_call_operand.vmem [shape: f32[2,1,128], index: 5, kind: output, shape index: {1}]   ;;  %s2430_s6 = inlined_call_operand.vmem [shape: f32[2,1,128], index: 6, kind: output, shape index: {2}]  }
   0x1   :  { %14 = vsyncpa [#allocation3 + $0x1], 0 }
   0x2   :  { %15 = vsyncpa [#allocation5], 0 }
   0x3   :  { %17 = vsyncpa [#allocation5 + $0x1], 0  ;;  %s1702_s21 = smov 0   ;;  %s1704_s22 = smov 0  }
   0x4   :  { %s1706_s23 = smov 0   ;;  %s1708_s24 = smov 0  }
   0x5 LB: > { %s1721_s25 = sadd.s32 4294967295, %s1658_s24   ;;  %s1724_s26 = sadd.s32 1, %s1658_s24   ;;  %s1658_s24 = sphi %s1708_s24, %s2502_s24   ;;  %s1654_s23 = sphi %s1706_s23, %s2501_s23   ;;  %s1650_s22 = sphi %s1704_s22, %s2500_s22   ;;  %s1646_s21 = sphi %s1702_s21, %s2499_s21  }
   0x6   : > { %s27_s27 = ssub.s32 %s1658_s24, %s1724_s26  ;;  %s30_s28 = sadd.s32 1, %s1654_s23 }
   0x7   : > { %p28_p0 = scmp.eq.s32.totalorder %s27_s27, 0  ;;  %p37_p1 = scmp.ne.s32.totalorder %s1654_s23, %s1650_s22 }
   0x8   : > { %p38_p2 = scmp.eq.s32.totalorder %s1658_s24, 0  ;;  %p43_p3 = scmp.ne.s32.totalorder %s1650_s22, %s1646_s21 }
   0x9   : > { %s1734_s29 = scalar_select %p28_p0, %s1654_s23, %s30_s28  }
   0xa   : > { %p39_p4 = por %p38_p2, %p37_p1  ;;  %p44_p5 = scmp.eq.s32.totalorder %s1721_s25, 0 }
   0xb   : > { %p1514_p6 = scmp.lt.s32.totalorder %s1658_s24, 2  ;;  %s1743_s7 = sand.u32 1, %s1654_s23  }
   0xc   : > { %p1738_p7 = por %p44_p5, %p43_p3  ;;  %s1354_s8 = sshll.u32 %s1743_s7, 4 }
   0xd   : > { %s1500_s9 = sshll.u32 %s1658_s24, 8  ;;  %s227_s13 = scalar_lea.vmem [#allocation2], %s1354_s8 }
   0xe   : > { %s2434_s30 = scalar_select %p1738_p7, 1, 0 }
   0xf   : > { %s1750_s12 = scalar_lea.hbm %s2424_s0, %s1500_s9  ;;  %s235_s14 = sshll.u32 %s227_s13, 4  ;;  %s1752_s14 = int_to_ptr.vmem [resolvable:$true] %s235_s14 }
  0x10   : > { %p1754_p8 = pnand %p1514_p6, %p39_p4  ;;  %s224_s16 = scalar_lea.sflag [#allocation3], %s1743_s7 }
  0x11   : > { %s1560_s17 = scalar_lea.hbm %s1750_s12, 256  ;;  %s1565_s20 = scalar_lea.hbm %s2424_s0, 512 }
  0x12   : > { %p1561_p11 = scmp.ne.s32.totalorder %s1750_s12, %s1560_s17  ;;  %p1562_p12 = pneg %p1754_p8 }
  0x13   : > { %p1566_p1 = scmp.lt.u32.totalorder %s1750_s12, %s2424_s0  ;;  %p1567_p2 = scmp.lt.u32.totalorder %s1565_s20, %s1560_s17 }
  0x14   : > { %p1563_p13 = pnand %p1562_p12, %p1561_p11  ;;  %p1569_p4 = scmp.lt.u32.totalorder %s1560_s17, %s1750_s12 }
  0x15   : > { %p1568_p3 = por %p1567_p2, %p1566_p1 }
  0x16   : > { %p1564_p0 = pneg %p1563_p13 }
  0x17   : > { %p1570_p5 = por %p1569_p4, %p1568_p3 }
  0x19   : > { %p1571_p6 = pnand %p1570_p5, %p1564_p0 }
  0x1b   : > { %1574 = shalt.err (!%p1571_p6)
}
  0x1c   : > { %s1575_s28 = scalar_lea.vmem %s1752_s14, 256  ;;  %s1660_s8 = smov [#allocation2]  }
  0x1d   : > { %p1576_p11 = scmp.ne.s32.totalorder %s1752_s14, %s1575_s28  ;;  %s1580_s9 = sshll.u32 %s1660_s8, 4  ;;  %s1581_s9 = int_to_ptr.vmem [resolvable:$false] %s1580_s9 }
  0x1e   : > { %s1582_s10 = scalar_lea.vmem %s1581_s9, 512  ;;  %p1583_p10 = scmp.lt.s32.totalorder %s1752_s14, %s1581_s9 }
  0x1f   : > { %p1578_p13 = pnand %p1576_p11, %p1562_p12  ;;  %p1584_p1 = scmp.lt.s32.totalorder %s1582_s10, %s1575_s28 }
  0x21   : > { %p1579_p9 = pneg %p1578_p13  ;;  %p1585_p2 = por %p1584_p1, %p1583_p10 }
  0x23   : > { %p1586_p3 = pnand %p1585_p2, %p1579_p9 }
  0x25   : > { %1589 = shalt.err (!%p1586_p3)
}
  0x26   : > { %1510 = dma.hbm_to_vmem [thread:$0]  (!%p1754_p8), %s1750_s12, 256, %s1752_s14, %s224_s16  }
  0x27   : > { %p2436_p0 = scmp.lt.s32.totalorder %s1658_s24, 3  ;;  %p2437_p4 = scmp.ge.s32.totalorder %s1658_s24, 1 }
  0x28   : > { %s1357_s13 = sshll.u32 %s1743_s7, 3  ;;  %s1501_s17 = sshll.u32 %s1658_s24, 7 }
  0x29   : > { %p1790_p5 = pnand %p2437_p4, %p2436_p0  ;;  %s1799_s20 = scalar_lea.hbm %s2427_s3, %s1501_s17 }
  0x2a   : > { %s261_s21 = scalar_lea.vmem [#allocation4], %s1357_s13  ;;  %s258_s12 = scalar_lea.sflag [#allocation5], %s1743_s7 }
  0x2b   : > { %s2438_s11 = scalar_select %p1790_p5, 1, 0 }
  0x2c   : > { %s269_s27 = sshll.u32 %s261_s21, 4  ;;  %s1590_s14 = scalar_lea.hbm %s1799_s20, 128  ;;  %s270_s27 = int_to_ptr.vmem [resolvable:$true] %s269_s27 }
  0x2d   : > { %p1591_p9 = scmp.ne.s32.totalorder %s1799_s20, %s1590_s14  ;;  %s1595_s28 = scalar_lea.hbm %s2427_s3, 256 }
  0x2e   : > { %p1596_p11 = scmp.lt.u32.totalorder %s1799_s20, %s2427_s3  ;;  %p1597_p13 = scmp.lt.u32.totalorder %s1595_s28, %s1590_s14 }
  0x2f   : > { %p1593_p10 = pnand %p1591_p9, %p1562_p12  ;;  %p1599_p2 = scmp.lt.u32.totalorder %s1590_s14, %s1799_s20 }
  0x30   : > { %p1598_p1 = por %p1597_p13, %p1596_p11 }
  0x31   : > { %p1594_p6 = pneg %p1593_p10 }
  0x32   : > { %p1600_p3 = por %p1599_p2, %p1598_p1 }
  0x34   : > { %p1601_p0 = pnand %p1600_p3, %p1594_p6 }
  0x36   : > { %1604 = shalt.err (!%p1601_p0)
}
  0x37   : > { %s1605_s7 = scalar_lea.vmem %s270_s27, 128  ;;  %s1661_s10 = smov [#allocation4]  }
  0x38   : > { %p1606_p4 = scmp.ne.s32.totalorder %s270_s27, %s1605_s7  ;;  %s1610_s13 = sshll.u32 %s1661_s10, 4  ;;  %s1611_s13 = int_to_ptr.vmem [resolvable:$false] %s1610_s13 }
  0x39   : > { %s1612_s17 = scalar_lea.vmem %s1611_s13, 256  ;;  %p1613_p7 = scmp.lt.s32.totalorder %s270_s27, %s1611_s13 }
  0x3a   : > { %p1608_p9 = pnand %p1606_p4, %p1562_p12  ;;  %p1614_p5 = scmp.lt.s32.totalorder %s1612_s17, %s1605_s7 }
  0x3c   : > { %p1609_p10 = pneg %p1608_p9  ;;  %p1615_p11 = por %p1614_p5, %p1613_p7 }
  0x3e   : > { %p1616_p13 = pnand %p1615_p11, %p1609_p10 }
  0x40   : > { %1619 = shalt.err (!%p1616_p13)
}
  0x41   : > { %1513 = dma.hbm_to_vmem [thread:$0]  (!%p1754_p8), %s1799_s20, 128, %s270_s27, %s258_s12  }
  0x42   : > { %p2439_p6 = scmp.ne.s32.totalorder %s2438_s11, 0 }
  0x43   : > { %s280_s18 = sand.u32 (!%p2439_p6), 1, %s1650_s22   ;;  %p2440_p12 = scmp.ne.s32.totalorder (!%p2439_p6), %s2434_s30, 0 }
  0x44   : > { %278 = sbr.rel (%p2439_p6) target bundleno = 768 (0x300), region = 36  ;;  %s1361_s19 = sshll.u32 (!%p2439_p6), %s280_s18, 4 }
  0x45   : > { %s281_s21 = scalar_lea.sflag (!%p2439_p6), [#allocation3], %s280_s18  ;;  %s284_s14 = scalar_lea.vmem (!%p2439_p6), [#allocation2], %s1361_s19 }
  0x4b   : > { %1637 = dma.done.wait (%p2440_p12), %s281_s21, 256  }
  0x4c   : > { %1639 = vsyncadd (%p2440_p12), %s281_s21, 4294967040  ;;  %s1362_s24 = sshll.u32 %s280_s18, 3  ;;  %s290_s16 = scalar_lea.sflag [#allocation5], %s280_s18 }
  0x4d   : > { %s1828_s15 = scalar_lea.vmem [#allocation4], %s1362_s24 }
  0x4e   : > { %1641 = dma.done.wait (%p2440_p12), %s290_s16, 128  }
  0x4f   : > { %1643 = vsyncadd (%p2440_p12), %s290_s16, 4294967168  ;;  %v1834_v0 = vld [vmem:[%s284_s14] sm:$0xff]  ;;  %v1836_v1 = vld [vmem:[%s284_s14 + $0x8] sm:$0xff]  ;;  %p340_p7 = scmp.lt.s32.totalorder %s1721_s25, 1  ;;  %v406_v32 = vlaneseq  ;;  %v1662_v33 = vmov 1966171168  }
  0x50   : > { %v364_v2 = vrot.slane %v1834_v0, 4  ;;  %v370_v3 = vrot.slane %v1836_v1, 4  ;;  %v427_v34 = vunpack.c.l.s4 %v1662_v33  ;;  %v1663_v55 = vmov 1065369472  }
  0x51   : > { %s2504_s25 = smov (!%p340_p7, %s1721_s25), 1  ;;  %v1850_v39 = vshrl.u32 %v406_v32, 7  ;;  %1065 = vmatprep.mubr.bf16.mxu0 %v1663_v55  ;;  %v1664_v56 = vmov 0.0   ;;  %vm2432_vm1 = vcmask 1040384   ;;  %v1932_v63 = vand.u32 127, %v406_v32 }
  0x52   : > { %v365_v4 = vmax.f32 %v1834_v0, %v364_v2  ;;  %v371_v5 = vmax.f32 %v1836_v1, %v370_v3  ;;  %s1365_s30 = sshll.u32 %s2504_s25, 1  ;;  %v428_v40 = vunpack.c.0.s8 %v427_v34  ;;  %s357_s8 = scalar_lea.vmem %s2430_s6, %s2504_s25 }
  0x53   : > { %s348_s27 = scalar_lea.vmem %s2426_s2, %s1365_s30  ;;  %v1871_v49 = vsub.s32 0, %v1850_v39  ;;  %v1874_v50 = vsub.s32 1, %v1850_v39  ;;  %v519_v3 = vadd.s32 8, %v1850_v39  ;;  %vm681_vm2 = vcmp.lt.s32.totalorder %v1850_v39, %v1932_v63  ;;  %s1502_s9 = sshll.u32 %s2504_s25, 3 }
  0x54   : > { %v366_v6 = vrot.slane %v365_v4, 2  ;;  %v372_v7 = vrot.slane %v371_v5, 2  ;;  %v1864_v45 = vsub.s32 %v428_v40, %v1850_v39  ;;  %v1866_v46 = vld [vmem:[%s348_s27] sm:$0x3]  ;;  %v528_v34 = vadd.s32 80, %v1850_v39  ;;  %s344_s13 = scalar_lea.vmem %s2425_s1, %s1502_s9  ;;  %s354_s19 = scalar_lea.vmem %s2429_s5, %s2504_s25 }
  0x55   : > { %vm2433_vm0 = vcmp.gt.s32.totalorder %v1866_v46, 0  ;;  %vm683_vm9 = vcmp.lt.s32.totalorder %v519_v3, %v1932_v63  ;;  %v533_v3 = vadd.s32 120, %v1850_v39  ;;  %s351_s24 = scalar_lea.vmem %s2428_s4, %s2504_s25 }
  0x56   : > { %v367_v8 = vmax.f32 %v365_v4, %v366_v6  ;;  %v373_v9 = vmax.f32 %v371_v5, %v372_v7  ;;  %v1366_v57 = vsel %vm2433_vm0, 1.0, %v1664_v56  ;;  %v520_v5 = vadd.s32 16, %v1850_v39 }
  0x57   : > { %v1922_v58 = vrot.slane %v1366_v57, %v1871_v49  ;;  %v1925_v59 = vrot.slane %v1366_v57, %v1874_v50  ;;  %v535_v57 = vadd.s32 136, %v1850_v39  ;;  %v2449_v6 = vmov 0 }
  0x58   : > { %v368_v10 = vrot.slane %v367_v8, 1  ;;  %v374_v11 = vrot.slane %v373_v9, 1 }
  0x59   : > { %v417_v60 = vsel %vm2432_vm1, %v1922_v58, 0.0  ;;  %v418_v61 = vsel %vm2432_vm1, %v1925_v59, 0.0 }
  0x5a   : > { %v369_v12 = vmax.f32 %v367_v8, %v368_v10  ;;  %v375_v13 = vmax.f32 %v373_v9, %v374_v11  ;;  %v419_v62 = vadd.f32 %v418_v61, %v417_v60  ;;  %v1665_v8 = vmov 1.0|1.0  }
  0x5b   : > { %v521_v10 = vadd.s32 24, %v1850_v39  ;;  %v536_v60 = vadd.s32 144, %v1850_v39 }
  0x5c   : > { %v376_v14 = vsub.f32 %v1834_v0, %v369_v12  ;;  %v377_v15 = vsub.f32 %v1836_v1, %v375_v13 }
  0x5e   : > { %v378_v16 = vmul.f32 1.442695, %v376_v14  ;;  %v380_v17 = vmul.f32 1.442695, %v377_v15  ;;  %v540_v14 = vadd.s32 176, %v1850_v39 }
  0x60   : > { %1552 = vpow2.f32 %v378_v16  ;;  %v523_v16 = vadd.s32 40, %v1850_v39 }
  0x61   : > { %1554 = vpow2.f32 %v380_v17 }
  0x6a   : > { %v1553_v18 = vpop.eup %1552 }
  0x6b   : > { %v1555_v19 = vpop.eup %1554  ;;  %v382_v20 = vrot.slane %v1553_v18, 4 }
  0x6c   : > { %v388_v21 = vrot.slane %v1555_v19, 4 }
  0x6d   : > { %v383_v22 = vadd.f32 %v1553_v18, %v382_v20  ;;  %v524_v20 = vadd.s32 48, %v1850_v39 }
  0x6e   : > { %v389_v23 = vadd.f32 %v1555_v19, %v388_v21 }
  0x6f   : > { %v384_v24 = vrot.slane %v383_v22, 2 }
  0x70   : > { %v390_v25 = vrot.slane %v389_v23, 2 }
  0x71   : > { %v385_v26 = vadd.f32 %v384_v24, %v383_v22 }
  0x72   : > { %v391_v27 = vadd.f32 %v390_v25, %v389_v23  ;;  %v525_v23 = vadd.s32 56, %v1850_v39 }
  0x73   : > { %v386_v28 = vrot.slane %v385_v26, 1 }
  0x74   : > { %v392_v29 = vrot.slane %v391_v27, 1 }
  0x75   : > { %v387_v30 = vadd.f32 %v386_v28, %v385_v26  ;;  %v527_v28 = vadd.s32 72, %v1850_v39 }
  0x76   : > { %v393_v31 = vadd.f32 %v392_v29, %v391_v27  ;;  %v526_v27 = vadd.s32 64, %v1850_v39 }
  0x77   : > { %1556 = vlog2.f32 %v387_v30 }
  0x78   : > { %1558 = vlog2.f32 %v393_v31 }
  0x81   : > { %v1557_v35 = vpop.eup %1556 }
  0x82   : > { %v1559_v36 = vpop.eup %1558  ;;  %v395_v37 = vmul.f32 0.6931472, %v1557_v35  ;;  %v529_v35 = vadd.s32 88, %v1850_v39 }
  0x83   : > { %v397_v38 = vmul.f32 0.6931472, %v1559_v36 }
  0x84   : > { %v1852_v41 = vadd.f32 %v395_v37, %v369_v12 }
  0x85   : > { %v1854_v42 = vadd.f32 %v397_v38, %v375_v13  ;;  %v522_v13 = vadd.s32 32, %v1850_v39 }
  0x86   : > { %v400_v43 = vsub.f32 %v1852_v41, %v1834_v0 }
  0x87   : > { %v401_v44 = vsub.f32 %v1854_v42, %v1836_v1 }
  0x89   : > { %v425_v47 = vcombine.low %v400_v43, %v401_v44  ;;  %v530_v43 = vadd.s32 96, %v1850_v39  ;;  %v531_v44 = vadd.s32 104, %v1850_v39 }
  0x8b   : > { %v432_v48 = vrot.slane %v425_v47, %v1864_v45 }
  0x8d   : > { %v439_v51 = vrot.slane %v432_v48, %v1864_v45  ;;  %v534_v48 = vadd.s32 128, %v1850_v39 }
  0x8f   : > { %v441_v52 = vsel %vm2433_vm0, -1e+30, %v439_v51  ;;  %v2064_v51 = vadd.s32 128, %v1932_v63 }
  0x90   : > { %v1880_v53 = vrot.slane %v441_v52, %v1871_v49  ;;  %v1883_v54 = vrot.slane %v441_v52, %v1874_v50 }
  0x92   : > { %453 = vxpose.xlu0.b32.start [1/16] %v1880_v53, 128  ;;  %485 = vxpose.xlu1.b32.start [1/16] %v1883_v54, 128 }
  0x96   : > { %454 = vxpose.xlu0.b32.cont [2/16] %v1880_v53, 128  ;;  %486 = vxpose.xlu1.b32.cont [2/16] %v1883_v54, 128 }
  0x9a   : > { %455 = vxpose.xlu0.b32.cont [3/16] %v1880_v53, 128  ;;  %487 = vxpose.xlu1.b32.cont [3/16] %v1883_v54, 128 }
  0x9e   : > { %456 = vxpose.xlu0.b32.cont [4/16] %v1880_v53, 128  ;;  %488 = vxpose.xlu1.b32.cont [4/16] %v1883_v54, 128 }
  0xa2   : > { %457 = vxpose.xlu0.b32.cont [5/16] %v1880_v53, 128  ;;  %489 = vxpose.xlu1.b32.cont [5/16] %v1883_v54, 128 }
  0xa6   : > { %458 = vxpose.xlu0.b32.cont [6/16] %v1880_v53, 128  ;;  %490 = vxpose.xlu1.b32.cont [6/16] %v1883_v54, 128 }
  0xaa   : > { %459 = vxpose.xlu0.b32.cont [7/16] %v1880_v53, 128  ;;  %491 = vxpose.xlu1.b32.cont [7/16] %v1883_v54, 128 }
  0xae   : > { %460 = vxpose.xlu0.b32.cont [8/16] %v1880_v53, 128  ;;  %492 = vxpose.xlu1.b32.cont [8/16] %v1883_v54, 128 }
  0xb2   : > { %461 = vxpose.xlu0.b32.cont [9/16] %v1880_v53, 128  ;;  %493 = vxpose.xlu1.b32.cont [9/16] %v1883_v54, 128 }
  0xb6   : > { %462 = vxpose.xlu0.b32.cont [10/16] %v1880_v53, 128  ;;  %494 = vxpose.xlu1.b32.cont [10/16] %v1883_v54, 128 }
  0xba   : > { %463 = vxpose.xlu0.b32.cont [11/16] %v1880_v53, 128  ;;  %495 = vxpose.xlu1.b32.cont [11/16] %v1883_v54, 128 }
  0xbe   : > { %464 = vxpose.xlu0.b32.cont [12/16] %v1880_v53, 128  ;;  %496 = vxpose.xlu1.b32.cont [12/16] %v1883_v54, 128 }
  0xc2   : > { %465 = vxpose.xlu0.b32.cont [13/16] %v1880_v53, 128  ;;  %497 = vxpose.xlu1.b32.cont [13/16] %v1883_v54, 128 }
  0xc6   : > { %466 = vxpose.xlu0.b32.cont [14/16] %v1880_v53, 128  ;;  %498 = vxpose.xlu1.b32.cont [14/16] %v1883_v54, 128 }
  0xca   : > { %467 = vxpose.xlu0.b32.cont [15/16] %v1880_v53, 128  ;;  %499 = vxpose.xlu1.b32.cont [15/16] %v1883_v54, 128 }
  0xce   : > { %468 = vxpose.xlu0.b32.end [16/16] %v1880_v53, 128  ;;  %500 = vxpose.xlu1.b32.end [16/16] %v1883_v54, 128 }
  0xfb   : > { %420 = vadd.xlane.f32.xlu0 %v419_v62  ;;  %v537_v62 = vadd.s32 152, %v1850_v39 }
 0x112   : > { %v469_v2 = vpop.trf.xlu0  ;;  %v1950_v7 = vpop.trf.xlu1 }
 0x113   : > { %vm554_vm3 = vcmp.gt.f32.partialorder %v469_v2, %v1883_v54  ;;  %vm618_vm4 = vcmp.eq.f32.partialorder %v469_v2, %v1883_v54  ;;  %vm617_vm5 = vcmp.eq.f32.partialorder %v469_v2, %v1880_v53  ;;  %vm553_vm6 = vcmp.gt.f32.partialorder %v469_v2, %v1880_v53 }
 0x114   : > { %vm745_vm7 = vmand %vm617_vm5, %vm681_vm2  ;;  %v532_v2 = vadd.s32 112, %v1850_v39 }
 0x115   : > { %vm810_vm8 = vmor %vm554_vm3, %vm618_vm4  ;;  %vm685_vm4 = vcmp.lt.s32.totalorder %v520_v5, %v1932_v63  ;;  %v2447_v5 = vmov 0 }
 0x116   : > { %v470_v4 = vpop.trf.xlu0  ;;  %vm1946_vm13 = vmor %vm553_vm6, %vm745_vm7  ;;  %v1963_v11 = vpop.trf.xlu1 }
 0x117   : > { %vm556_vm10 = vcmp.gt.f32.partialorder %v470_v4, %v1883_v54  ;;  %vm620_vm11 = vcmp.eq.f32.partialorder %v470_v4, %v1883_v54  ;;  %vm619_vm12 = vcmp.eq.f32.partialorder %v470_v4, %v1880_v53  ;;  %vm555_vm15 = vcmp.gt.f32.partialorder %v470_v4, %v1880_v53 }
 0x118   : > { %vm812_vm14 = vmor %vm556_vm10, %vm620_vm11 }
 0x119   : > { %vm1431_vm2 = vmpackc.low %vm812_vm14, %vm810_vm8 }
 0x11a   : > { %1432 = vmatprep.subr.msk.bf16.mxu0 %vm1431_vm2, %v1665_v8  ;;  %v471_v9 = vpop.trf.xlu0  ;;  %vm747_vm3 = vmand %vm619_vm12, %vm683_vm9  ;;  %vm687_vm2 = vcmp.lt.s32.totalorder %v521_v10, %v1932_v63  ;;  %v1981_v17 = vpop.trf.xlu1  ;;  %v539_v10 = vadd.s32 168, %v1850_v39 }
 0x11b   : > { %vm621_vm5 = vcmp.eq.f32.partialorder %v471_v9, %v1880_v53  ;;  %vm811_vm1 = vmor %vm555_vm15, %vm747_vm3  ;;  %vm558_vm6 = vcmp.gt.f32.partialorder %v471_v9, %v1883_v54  ;;  %vm622_vm7 = vcmp.eq.f32.partialorder %v471_v9, %v1883_v54  ;;  %vm557_vm8 = vcmp.gt.f32.partialorder %v471_v9, %v1880_v53 }
 0x11c   : > { %vm1433_vm10 = vmpackc.low %vm811_vm1, %vm1946_vm13  ;;  %v538_v9 = vadd.s32 160, %v1850_v39 }
 0x11d   : > { %1434 = vmatpush1.bf16.msk.msra.mxu0 %vm1433_vm10, %v1665_v8  ;;  %vm814_vm11 = vmor %vm558_vm6, %vm622_vm7 }
 0x11e   : > { %v472_v12 = vpop.trf.xlu0  ;;  %vm749_vm9 = vmand %vm621_vm5, %vm685_vm4  ;;  %vm689_vm5 = vcmp.lt.s32.totalorder %v522_v13, %v1932_v63  ;;  %v1997_v21 = vpop.trf.xlu1 }
 0x11f   : > { %vm623_vm12 = vcmp.eq.f32.partialorder %v472_v12, %v1880_v53  ;;  %vm560_vm14 = vcmp.gt.f32.partialorder %v472_v12, %v1883_v54  ;;  %vm624_vm15 = vcmp.eq.f32.partialorder %v472_v12, %v1883_v54  ;;  %vm1970_vm1 = vmor %vm557_vm8, %vm749_vm9  ;;  %vm559_vm3 = vcmp.gt.f32.partialorder %v472_v12, %v1880_v53 }
 0x120   : > { %vm816_vm13 = vmor %vm560_vm14, %vm624_vm15 }
 0x121   : > { %vm1435_vm6 = vmpackc.low %vm816_vm13, %vm814_vm11 }
 0x122   : > { %1436 = vmatprep.subr.msk.bf16.mxu0 %vm1435_vm6, %v1665_v8  ;;  %v473_v15 = vpop.trf.xlu0  ;;  %vm751_vm4 = vmand %vm623_vm12, %vm687_vm2  ;;  %v2012_v25 = vpop.trf.xlu1 }
 0x123   : > { %vm625_vm7 = vcmp.eq.f32.partialorder %v473_v15, %v1880_v53  ;;  %vm815_vm10 = vmor %vm559_vm3, %vm751_vm4  ;;  %vm562_vm0 = vcmp.gt.f32.partialorder %v473_v15, %v1883_v54  ;;  %vm626_vm8 = vcmp.eq.f32.partialorder %v473_v15, %v1883_v54  ;;  %vm561_vm9 = vcmp.gt.f32.partialorder %v473_v15, %v1880_v53 }
 0x124   : > { %vm1437_vm11 = vmpackc.low %vm815_vm10, %vm1970_vm1  ;;  %vm691_vm3 = vcmp.lt.s32.totalorder %v523_v16, %v1932_v63  ;;  %v541_v15 = vadd.s32 184, %v1850_v39 }
 0x125   : > { %1438 = vmatpush1.bf16.msk.msra.mxu0 %vm1437_vm11, %v1665_v8  ;;  %vm818_vm12 = vmor %vm562_vm0, %vm626_vm8 }
 0x126   : > { %v474_v18 = vpop.trf.xlu0  ;;  %vm753_vm14 = vmand %vm625_vm7, %vm689_vm5  ;;  %v2021_v29 = vpop.trf.xlu1 }
 0x127   : > { %vm627_vm15 = vcmp.eq.f32.partialorder %v474_v18, %v1880_v53  ;;  %vm564_vm2 = vcmp.gt.f32.partialorder %v474_v18, %v1883_v54  ;;  %vm628_vm13 = vcmp.eq.f32.partialorder %v474_v18, %v1883_v54  ;;  %vm1991_vm6 = vmor %vm561_vm9, %vm753_vm14  ;;  %vm563_vm4 = vcmp.gt.f32.partialorder %v474_v18, %v1880_v53 }
 0x128   : > { %vm820_vm1 = vmor %vm564_vm2, %vm628_vm13  ;;  %v2458_v18 = vmov 0 }
 0x129   : > { %vm1439_vm0 = vmpackc.low %vm820_vm1, %vm818_vm12  ;;  %vm693_vm12 = vcmp.lt.s32.totalorder %v524_v20, %v1932_v63  ;;  %v542_v20 = vadd.s32 192, %v1850_v39 }
 0x12a   : > { %1440 = vmatprep.subr.msk.bf16.mxu0 %vm1439_vm0, %v1665_v8  ;;  %v475_v22 = vpop.trf.xlu0  ;;  %vm755_vm5 = vmand %vm627_vm15, %vm691_vm3  ;;  %vm695_vm3 = vcmp.lt.s32.totalorder %v525_v23, %v1932_v63  ;;  %v2033_v32 = vpop.trf.xlu1 }
 0x12b   : > { %vm819_vm7 = vmor %vm563_vm4, %vm755_vm5  ;;  %vm566_vm10 = vcmp.gt.f32.partialorder %v475_v22, %v1883_v54  ;;  %vm630_vm8 = vcmp.eq.f32.partialorder %v475_v22, %v1883_v54  ;;  %vm629_vm11 = vcmp.eq.f32.partialorder %v475_v22, %v1880_v53 }
 0x12c   : > { %vm1441_vm9 = vmpackc.low %vm819_vm7, %vm1991_vm6  ;;  %vm565_vm6 = vcmp.gt.f32.partialorder %v475_v22, %v1880_v53  ;;  %v543_v22 = vadd.s32 200, %v1850_v39 }
 0x12d   : > { %1442 = vmatpush1.bf16.msk.msra.mxu0 %vm1441_vm9, %v1665_v8  ;;  %vm822_vm14 = vmor %vm566_vm10, %vm630_vm8 }
 0x12e   : > { %v476_v24 = vpop.trf.xlu0  ;;  %vm757_vm1 = vmand %vm629_vm11, %vm693_vm12  ;;  %v2042_v36 = vpop.trf.xlu1 }
 0x12f   : > { %vm631_vm15 = vcmp.eq.f32.partialorder %v476_v24, %v1880_v53  ;;  %vm568_vm2 = vcmp.gt.f32.partialorder %v476_v24, %v1883_v54  ;;  %vm632_vm13 = vcmp.eq.f32.partialorder %v476_v24, %v1883_v54  ;;  %vm567_vm5 = vcmp.gt.f32.partialorder %v476_v24, %v1880_v53  ;;  %vm821_vm10 = vmor %vm565_vm6, %vm757_vm1 }
 0x130   : > { %vm824_vm4 = vmor %vm568_vm2, %vm632_vm13  ;;  %vm699_vm6 = vcmp.lt.s32.totalorder %v527_v28, %v1932_v63  ;;  %v2469_v28 = vmov 0 }
 0x131   : > { %vm1443_vm0 = vmpackc.low %vm824_vm4, %vm822_vm14 }
 0x132   : > { %1444 = vmatprep.subr.msk.bf16.mxu0 %vm1443_vm0, %v1665_v8  ;;  %v477_v26 = vpop.trf.xlu0  ;;  %vm759_vm7 = vmand %vm631_vm15, %vm695_vm3  ;;  %vm697_vm3 = vcmp.lt.s32.totalorder %v526_v27, %v1932_v63  ;;  %v2051_v40 = vpop.trf.xlu1 }
 0x133   : > { %vm823_vm8 = vmor %vm567_vm5, %vm759_vm7  ;;  %vm570_vm11 = vcmp.gt.f32.partialorder %v477_v26, %v1883_v54  ;;  %vm634_vm12 = vcmp.eq.f32.partialorder %v477_v26, %v1883_v54  ;;  %vm633_vm2 = vcmp.eq.f32.partialorder %v477_v26, %v1880_v53  ;;  %vm569_vm5 = vcmp.gt.f32.partialorder %v477_v26, %v1880_v53 }
 0x134   : > { %vm1445_vm9 = vmpackc.low %vm823_vm8, %vm821_vm10  ;;  %v545_v26 = vadd.s32 216, %v1850_v39 }
 0x135   : > { %1446 = vmatpush1.bf16.msk.msra.mxu0 %vm1445_vm9, %v1665_v8  ;;  %vm826_vm13 = vmor %vm570_vm11, %vm634_vm12 }
 0x136   : > { %v478_v30 = vpop.trf.xlu0  ;;  %vm761_vm10 = vmand %vm633_vm2, %vm697_vm3  ;;  %v2068_v52 = vpop.trf.xlu1 }
 0x137   : > { %vm572_vm14 = vcmp.gt.f32.partialorder %v478_v30, %v1883_v54  ;;  %vm636_vm15 = vcmp.eq.f32.partialorder %v478_v30, %v1883_v54  ;;  %vm635_vm1 = vcmp.eq.f32.partialorder %v478_v30, %v1880_v53  ;;  %vm571_vm7 = vcmp.gt.f32.partialorder %v478_v30, %v1880_v53  ;;  %vm825_vm9 = vmor %vm569_vm5, %vm761_vm10 }
 0x138   : > { %vm828_vm4 = vmor %vm572_vm14, %vm636_vm15  ;;  %vm703_vm5 = vcmp.lt.s32.totalorder %v529_v35, %v1932_v63 }
 0x139   : > { %vm1447_vm0 = vmpackc.low %vm828_vm4, %vm826_vm13  ;;  %vm701_vm4 = vcmp.lt.s32.totalorder %v528_v34, %v1932_v63  ;;  %v2480_v34 = vmov 0 }
 0x13a   : > { %v479_v31 = vpop.trf.xlu0  ;;  %1448 = vmatprep.subr.msk.bf16.mxu0 %vm1447_vm0, %v1665_v8  ;;  %vm763_vm8 = vmand %vm635_vm1, %vm699_vm6  ;;  %v2086_v4 = vpop.trf.xlu1 }
 0x13b   : > { %vm827_vm11 = vmor %vm571_vm7, %vm763_vm8  ;;  %vm574_vm14 = vcmp.gt.f32.partialorder %v479_v31, %v1883_v54  ;;  %vm638_vm15 = vcmp.eq.f32.partialorder %v479_v31, %v1883_v54  ;;  %vm637_vm3 = vcmp.eq.f32.partialorder %v479_v31, %v1880_v53  ;;  %vm573_vm10 = vcmp.gt.f32.partialorder %v479_v31, %v1880_v53 }
 0x13c   : > { %vm1449_vm12 = vmpackc.low %vm827_vm11, %vm825_vm9  ;;  %v2474_v31 = vmov 0 }
 0x13d   : > { %1450 = vmatpush1.bf16.msk.msra.mxu0 %vm1449_vm12, %v1665_v8  ;;  %vm830_vm1 = vmor %vm574_vm14, %vm638_vm15 }
 0x13e   : > { %v480_v33 = vpop.trf.xlu0  ;;  %vm765_vm9 = vmand %vm637_vm3, %vm701_vm4  ;;  %v2120_v13 = vpop.trf.xlu1 }
 0x13f   : > { %vm576_vm13 = vcmp.gt.f32.partialorder %v480_v33, %v1883_v54  ;;  %vm640_vm2 = vcmp.eq.f32.partialorder %v480_v33, %v1883_v54  ;;  %vm639_vm6 = vcmp.eq.f32.partialorder %v480_v33, %v1880_v53  ;;  %vm575_vm8 = vcmp.gt.f32.partialorder %v480_v33, %v1880_v53  ;;  %vm829_vm12 = vmor %vm573_vm10, %vm765_vm9 }
 0x140   : > { %vm832_vm0 = vmor %vm576_vm13, %vm640_vm2  ;;  %vm707_vm10 = vcmp.lt.s32.totalorder %v531_v44, %v1932_v63  ;;  %v549_v33 = vadd.s32 248, %v1850_v39 }
 0x141   : > { %vm1451_vm7 = vmpackc.low %vm832_vm0, %vm830_vm1  ;;  %vm705_vm0 = vcmp.lt.s32.totalorder %v530_v43, %v1932_v63 }
 0x142   : > { %v481_v37 = vpop.trf.xlu0  ;;  %1452 = vmatprep.subr.msk.bf16.mxu0 %vm1451_vm7, %v1665_v8  ;;  %vm767_vm11 = vmand %vm639_vm6, %vm703_vm5  ;;  %v2155_v19 = vpop.trf.xlu1 }
 0x143   : > { %vm831_vm14 = vmor %vm575_vm8, %vm767_vm11  ;;  %vm578_vm13 = vcmp.gt.f32.partialorder %v481_v37, %v1883_v54  ;;  %vm642_vm2 = vcmp.eq.f32.partialorder %v481_v37, %v1883_v54  ;;  %vm641_vm4 = vcmp.eq.f32.partialorder %v481_v37, %v1880_v53  ;;  %vm577_vm9 = vcmp.gt.f32.partialorder %v481_v37, %v1880_v53 }
 0x144   : > { %vm1453_vm15 = vmpackc.low %vm831_vm14, %vm829_vm12 }
 0x145   : > { %1454 = vmatpush1.bf16.msk.msra.mxu0 %vm1453_vm15, %v1665_v8  ;;  %vm834_vm6 = vmor %vm578_vm13, %vm642_vm2  ;;  %vm714_vm15 = vcmp.lt.s32.totalorder %v534_v48, %v2064_v51  ;;  %vm650_vm13 = vcmp.eq.f32.partialorder %v1950_v7, %v1883_v54 }
 0x146   : > { %v482_v38 = vpop.trf.xlu0  ;;  %vm769_vm12 = vmand %vm641_vm4, %vm705_vm0 }
 0x147   : > { %vm580_vm1 = vcmp.gt.f32.partialorder %v482_v38, %v1883_v54  ;;  %vm644_vm3 = vcmp.eq.f32.partialorder %v482_v38, %v1883_v54  ;;  %vm643_vm5 = vcmp.eq.f32.partialorder %v482_v38, %v1880_v53  ;;  %vm579_vm11 = vcmp.gt.f32.partialorder %v482_v38, %v1880_v53  ;;  %vm833_vm2 = vmor %vm577_vm9, %vm769_vm12 }
 0x148   : > { %vm836_vm7 = vmor %vm580_vm1, %vm644_vm3  ;;  %vm716_vm1 = vcmp.lt.s32.totalorder %v535_v57, %v2064_v51  ;;  %vm652_vm3 = vcmp.eq.f32.partialorder %v1963_v11, %v1883_v54  ;;  %vm654_vm12 = vcmp.eq.f32.partialorder %v1981_v17, %v1883_v54  ;;  %v1102_v38 = vrot.slane %v1866_v46, %v1874_v50 }
 0x149   : > { %vm1455_vm8 = vmpackc.low %vm836_vm7, %vm834_vm6 }
 0x14a   : > { %v483_v47 = vpop.trf.xlu0  ;;  %1456 = vmatprep.subr.msk.bf16.mxu0 %vm1455_vm8, %v1665_v8  ;;  %vm771_vm14 = vmand %vm643_vm5, %vm707_vm10 }
 0x14b   : > { %vm835_vm6 = vmor %vm579_vm11, %vm771_vm14  ;;  %vm582_vm0 = vcmp.gt.f32.partialorder %v483_v47, %v1883_v54  ;;  %vm646_vm5 = vcmp.eq.f32.partialorder %v483_v47, %v1883_v54  ;;  %vm718_vm11 = vcmp.lt.s32.totalorder %v536_v60, %v2064_v51  ;;  %vm581_vm14 = vcmp.gt.f32.partialorder %v483_v47, %v1880_v53 }
 0x14c   : > { %vm1457_vm4 = vmpackc.low %vm835_vm6, %vm833_vm2  ;;  %vm709_vm2 = vcmp.lt.s32.totalorder %v532_v2, %v1932_v63  ;;  %vm656_vm6 = vcmp.eq.f32.partialorder %v1997_v21, %v1883_v54 }
 0x14d   : > { %vm2090_vm7 = vmand %vm650_vm13, %vm714_vm15  ;;  %1458 = vmatpush1.bf16.msk.msra.mxu0 %vm1457_vm4, %v1665_v8  ;;  %vm645_vm15 = vcmp.eq.f32.partialorder %v483_v47, %v1880_v53  ;;  %vm711_vm4 = vcmp.lt.s32.totalorder %v533_v3, %v1932_v63  ;;  %v2454_v63 = vmov 0 }
 0x14e   : > { %v484_v61 = vpop.trf.xlu0  ;;  %v2448_v5 = vsel %vm2090_vm7, 4294967295, %v2447_v5  ;;  %vm2097_vm9 = vmand %vm652_vm3, %vm716_vm1 }
 0x14f   : > { %vm584_vm10 = vcmp.gt.f32.partialorder %v484_v61, %v1883_v54  ;;  %vm648_vm8 = vcmp.eq.f32.partialorder %v484_v61, %v1883_v54  ;;  %v2450_v6 = vsel %vm2097_vm9, 4294967295, %v2449_v6  ;;  %vm838_vm13 = vmor %vm582_vm0, %vm646_vm5  ;;  %vm647_vm1 = vcmp.eq.f32.partialorder %v484_v61, %v1880_v53 }
 0x150   : > { %vm840_vm3 = vmor %vm584_vm10, %vm648_vm8  ;;  %vm583_vm0 = vcmp.gt.f32.partialorder %v484_v61, %v1880_v53  ;;  %vm2453_vm10 = vcmp.lt.s32.totalorder %v537_v62, %v2064_v51 }
 0x151   : > { %vm1459_vm9 = vmpackc.low %vm840_vm3, %vm838_vm13  ;;  %vm722_vm3 = vcmp.lt.s32.totalorder %v538_v9, %v2064_v51 }
 0x152   : > { %vm2114_vm7 = vmand %vm654_vm12, %vm718_vm11  ;;  %1460 = vmatprep.subr.msk.bf16.mxu0 %vm1459_vm9, %v1665_v8  ;;  %vm658_vm11 = vcmp.eq.f32.partialorder %v2012_v25, %v1883_v54  ;;  %vm586_vm9 = vcmp.gt.f32.partialorder %v1950_v7, %v1883_v54 }
 0x153   : > { %vm773_vm5 = vmand %vm645_vm15, %vm709_vm2  ;;  %vm724_vm15 = vcmp.lt.s32.totalorder %v539_v10, %v2064_v51  ;;  %vm660_vm2 = vcmp.eq.f32.partialorder %v2021_v29, %v1883_v54 }
 0x154   : > { %vm2124_vm8 = vmand %vm656_vm6, %vm2453_vm10 }
 0x155   : > { %v2455_v63 = vsel %vm2124_vm8, 4294967295, %v2454_v63  ;;  %vm775_vm13 = vmand %vm647_vm1, %vm711_vm4  ;;  %vm588_vm1 = vcmp.gt.f32.partialorder %v1963_v11, %v1883_v54 }
 0x156   : > { %vm837_vm12 = vmor %vm581_vm14, %vm773_vm5  ;;  %vm585_vm14 = vcmp.gt.f32.partialorder %v1950_v7, %v1880_v53  ;;  %vm587_vm5 = vcmp.gt.f32.partialorder %v1963_v11, %v1880_v53  ;;  %v2198_v7 = vpop.trf.xlu1  ;;  %v544_v11 = vadd.s32 208, %v1850_v39 }
 0x157   : > { %vm839_vm6 = vmor %vm583_vm0, %vm775_vm13  ;;  %vm2460_vm0 = vnez %v2448_v5 }
 0x158   : > { %vm1461_vm4 = vmpackc.low %vm839_vm6, %vm837_vm12  ;;  %vm2461_vm12 = vnez %v2450_v6 }
 0x159   : > { %vm2140_vm10 = vmand %vm658_vm11, %vm722_vm3  ;;  %1462 = vmatpush1.bf16.msk.msra.mxu0 %vm1461_vm4, %v1665_v8  ;;  %vm726_vm3 = vcmp.lt.s32.totalorder %v540_v14, %v2064_v51  ;;  %vm662_vm11 = vcmp.eq.f32.partialorder %v2033_v32, %v1883_v54  ;;  %vm590_vm4 = vcmp.gt.f32.partialorder %v1981_v17, %v1883_v54 }
 0x15a   : > { %vm2149_vm8 = vmand %vm660_vm2, %vm724_vm15  ;;  %vm728_vm15 = vcmp.lt.s32.totalorder %v541_v15, %v2064_v51  ;;  %vm664_vm2 = vcmp.eq.f32.partialorder %v2042_v36, %v1883_v54  ;;  %v2246_v30 = vpop.trf.xlu1 }
 0x15b   : > { %v2459_v18 = vsel %vm2149_vm8, 4294967295, %v2458_v18  ;;  %vm842_vm13 = vmor %vm586_vm9, %vm2460_vm0  ;;  %vm592_vm0 = vcmp.gt.f32.partialorder %v1997_v21, %v1883_v54 }
 0x15c   : > { %vm844_vm6 = vmor %vm588_vm1, %vm2461_vm12 }
 0x15d   : > { %vm1463_vm9 = vmpackc.low %vm844_vm6, %vm842_vm13  ;;  %vm589_vm13 = vcmp.gt.f32.partialorder %v1981_v17, %v1880_v53  ;;  %vm591_vm6 = vcmp.gt.f32.partialorder %v1997_v21, %v1880_v53  ;;  %v546_v17 = vadd.s32 224, %v1850_v39  ;;  %v547_v21 = vadd.s32 232, %v1850_v39 }
 0x15e   : > { %1464 = vmatprep.subr.msk.bf16.mxu0 %vm1463_vm9, %v1665_v8  ;;  %vm1465_vm1 = vmpackc.low %vm587_vm5, %vm585_vm14  ;;  %vm730_vm14 = vcmp.lt.s32.totalorder %v542_v20, %v2064_v51  ;;  %vm666_vm5 = vcmp.eq.f32.partialorder %v2051_v40, %v1883_v54  ;;  %v516_v35 = vpop.trf.xlu1 }
 0x15f   : > { %vm2178_vm12 = vmand %vm662_vm11, %vm726_vm3  ;;  %1466 = vmatpush1.bf16.msk.msra.mxu0 %vm1465_vm1, %v1665_v8  ;;  %vm2466_vm3 = vnez %v2455_v63  ;;  %vm594_vm1 = vcmp.gt.f32.partialorder %v2012_v25, %v1883_v54 }
 0x160   : > { %vm2187_vm9 = vmand %vm664_vm2, %vm728_vm15  ;;  %vm732_vm15 = vcmp.lt.s32.totalorder %v543_v22, %v2064_v51  ;;  %vm668_vm2 = vcmp.eq.f32.partialorder %v2068_v52, %v1883_v54 }
 0x161   : > { %vm846_vm8 = vmor %vm590_vm4, %vm2114_vm7  ;;  %vm596_vm4 = vcmp.gt.f32.partialorder %v2021_v29, %v1883_v54 }
 0x162   : > { %vm848_vm11 = vmor %vm592_vm0, %vm2466_vm3 }
 0x163   : > { %vm1467_vm7 = vmpackc.low %vm848_vm11, %vm846_vm8  ;;  %vm672_vm11 = vcmp.eq.f32.partialorder %v2120_v13, %v1883_v54 }
 0x164   : > { %1468 = vmatprep.subr.msk.bf16.mxu0 %vm1467_vm7, %v1665_v8  ;;  %vm1469_vm0 = vmpackc.low %vm591_vm6, %vm589_vm13  ;;  %vm734_vm6 = vcmp.lt.s32.totalorder %v544_v11, %v2064_v51 }
 0x165   : > { %vm2216_vm3 = vmand %vm666_vm5, %vm730_vm14  ;;  %1470 = vmatpush1.bf16.msk.msra.mxu0 %vm1469_vm0, %v1665_v8  ;;  %vm670_vm14 = vcmp.eq.f32.partialorder %v2086_v4, %v1883_v54  ;;  %vm2471_vm5 = vnez %v2459_v18 }
 0x166   : > { %vm2225_vm7 = vmand %vm668_vm2, %vm732_vm15  ;;  %vm736_vm2 = vcmp.lt.s32.totalorder %v545_v26, %v2064_v51 }
 0x167   : > { %v2470_v28 = vsel %vm2225_vm7, 4294967295, %v2469_v28  ;;  %vm850_vm13 = vmor %vm594_vm1, %vm2140_vm10  ;;  %vm600_vm10 = vcmp.gt.f32.partialorder %v2042_v36, %v1883_v54  ;;  %vm2472_vm1 = vcmp.gt.f32.partialorder %v2012_v25, %v1880_v53  ;;  %v2476_v25 = vmov 0 }
 0x168   : > { %vm852_vm0 = vmor %vm596_vm4, %vm2471_vm5  ;;  %vm2473_vm4 = vcmp.gt.f32.partialorder %v2021_v29, %v1880_v53  ;;  %v548_v29 = vadd.s32 240, %v1850_v39 }
 0x169   : > { %vm1471_vm8 = vmpackc.low %vm852_vm0, %vm850_vm13  ;;  %vm604_vm13 = vcmp.gt.f32.partialorder %v2068_v52, %v1883_v54 }
 0x16a   : > { %1472 = vmatprep.subr.msk.bf16.mxu0 %vm1471_vm8, %v1665_v8  ;;  %vm1473_vm5 = vmpackc.low %vm2473_vm4, %vm2472_vm1  ;;  %vm599_vm8 = vcmp.gt.f32.partialorder %v2042_v36, %v1880_v53  ;;  %vm740_vm4 = vcmp.lt.s32.totalorder %v547_v21, %v2064_v51  ;;  %v2483_v36 = vmov 0 }
 0x16b   : > { %vm2257_vm15 = vmand %vm670_vm14, %vm734_vm6  ;;  %1474 = vmatpush1.bf16.msk.msra.mxu0 %vm1473_vm5, %v1665_v8  ;;  %vm674_vm6 = vcmp.eq.f32.partialorder %v2155_v19, %v1883_v54  ;;  %vm2478_vm14 = vcmp.gt.f32.partialorder %v2033_v32, %v1883_v54  ;;  %vm676_vm5 = vcmp.eq.f32.partialorder %v2198_v7, %v1883_v54 }
 0x16c   : > { %v2475_v31 = vsel %vm2257_vm15, 4294967295, %v2474_v31  ;;  %vm2267_vm7 = vmand %vm672_vm11, %vm736_vm2  ;;  %vm602_vm2 = vcmp.gt.f32.partialorder %v2051_v40, %v1883_v54  ;;  %vm608_vm15 = vcmp.gt.f32.partialorder %v2120_v13, %v1883_v54 }
 0x16d   : > { %v2477_v25 = vsel %vm2267_vm7, 4294967295, %v2476_v25  ;;  %vm854_vm1 = vmor %vm2478_vm14, %vm2178_vm12  ;;  %vm2479_vm12 = vcmp.lt.s32.totalorder %v546_v17, %v2064_v51  ;;  %v1666_v17 = vmov 0  }
 0x16e   : > { %vm856_vm11 = vmor %vm600_vm10, %vm2187_vm9  ;;  %vm2482_vm9 = vcmp.gt.f32.partialorder %v2033_v32, %v1880_v53 }
 0x16f   : > { %vm1475_vm0 = vmpackc.low %vm856_vm11, %vm854_vm1  ;;  %vm742_vm1 = vcmp.lt.s32.totalorder %v548_v29, %v2064_v51  ;;  %vm601_vm11 = vcmp.gt.f32.partialorder %v2051_v40, %v1880_v53 }
 0x170   : > { %vm2291_vm14 = vmand %vm674_vm6, %vm2479_vm12  ;;  %1476 = vmatprep.subr.msk.bf16.mxu0 %vm1475_vm0, %v1665_v8  ;;  %vm678_vm6 = vcmp.eq.f32.partialorder %v2246_v30, %v1883_v54  ;;  %vm603_vm0 = vcmp.gt.f32.partialorder %v2068_v52, %v1880_v53  ;;  %vm744_vm12 = vcmp.lt.s32.totalorder %v549_v33, %v2064_v51 }
 0x171   : > { %v2481_v34 = vsel %vm2291_vm14, 4294967295, %v2480_v34  ;;  %vm1477_vm10 = vmpackc.low %vm599_vm8, %vm2482_vm9  ;;  %vm680_vm9 = vcmp.eq.f32.partialorder %v516_v35, %v1883_v54 }
 0x172   : > { %vm2299_vm7 = vmand %vm676_vm5, %vm740_vm4  ;;  %1478 = vmatpush1.bf16.msk.msra.mxu0 %vm1477_vm10, %v1665_v8  ;;  %vm2485_vm4 = vnez %v2470_v28  ;;  %vm606_vm10 = vcmp.gt.f32.partialorder %v2086_v4, %v1883_v54 }
 0x173   : > { %v2484_v36 = vsel %vm2299_vm7, 4294967295, %v2483_v36  ;;  %vm858_vm8 = vmor %vm602_vm2, %vm2216_vm3  ;;  %vm605_vm2 = vcmp.gt.f32.partialorder %v2086_v4, %v1880_v53 }
 0x174   : > { %vm860_vm5 = vmor %vm604_vm13, %vm2485_vm4  ;;  %vm610_vm4 = vcmp.gt.f32.partialorder %v2155_v19, %v1883_v54 }
 0x175   : > { %vm2319_vm7 = vmand %vm678_vm6, %vm742_vm1  ;;  %vm607_vm1 = vcmp.gt.f32.partialorder %v2120_v13, %v1880_v53  ;;  %vm2490_vm6 = vnez %v2475_v31 }
 0x176   : > { %vm1479_vm14 = vmpackc.low %vm860_vm5, %vm858_vm8 }
 0x177   : > { %1480 = vmatprep.subr.msk.bf16.mxu0 %vm1479_vm14, %v1665_v8  ;;  %vm1481_vm3 = vmpackc.low %vm603_vm0, %vm601_vm11  ;;  %vm2491_vm14 = vnez %v2477_v25  ;;  %vm612_vm0 = vcmp.gt.f32.partialorder %v2198_v7, %v1883_v54 }
 0x178   : > { %1482 = vmatpush1.bf16.msk.msra.mxu0 %vm1481_vm3, %v1665_v8  ;;  %vm2327_vm13 = vmand %vm680_vm9, %vm744_vm12  ;;  %vm609_vm9 = vcmp.gt.f32.partialorder %v2155_v19, %v1880_v53  ;;  %vm611_vm3 = vcmp.gt.f32.partialorder %v2198_v7, %v1880_v53 }
 0x179   : > { %vm862_vm8 = vmor %vm606_vm10, %vm2490_vm6  ;;  %vm2492_vm10 = vnez %v2481_v34 }
 0x17a   : > { %vm864_vm11 = vmor %vm608_vm15, %vm2491_vm14  ;;  %vm614_vm15 = vcmp.gt.f32.partialorder %v2246_v30, %v1883_v54  ;;  %vm2493_vm14 = vnez %v2484_v36 }
 0x17b   : > { %vm1483_vm5 = vmpackc.low %vm864_vm11, %vm862_vm8 }
 0x17c   : > { %1484 = vmatprep.subr.msk.bf16.mxu0 %vm1483_vm5, %v1665_v8  ;;  %vm1485_vm12 = vmpackc.low %vm607_vm1, %vm605_vm2  ;;  %vm616_vm2 = vcmp.gt.f32.partialorder %v516_v35, %v1883_v54  ;;  %vm613_vm5 = vcmp.gt.f32.partialorder %v2246_v30, %v1880_v53  ;;  %v1098_v54 = vrot.slane %v1866_v46, %v1871_v49 }
 0x17d   : > { %1486 = vmatpush1.bf16.msk.msra.mxu0 %vm1485_vm12, %v1665_v8  ;;  %vm866_vm6 = vmor %vm610_vm4, %vm2492_vm10  ;;  %vm615_vm12 = vcmp.gt.f32.partialorder %v516_v35, %v1880_v53 }
 0x17e   : > { %vm868_vm8 = vmor %vm612_vm0, %vm2493_vm14 }
 0x17f   : > { %vm1487_vm1 = vmpackc.low %vm868_vm8, %vm866_vm6 }
 0x180   : > { %1488 = vmatprep.subr.msk.bf16.mxu0 %vm1487_vm1, %v1665_v8  ;;  %vm1489_vm11 = vmpackc.low %vm611_vm3, %vm609_vm9  ;;  %vm1170_vm3 = vcmask 1043456  }
 0x181   : > { %1490 = vmatpush1.bf16.msk.msra.mxu0 %vm1489_vm11, %v1665_v8  ;;  %vm870_vm4 = vmor %vm614_vm15, %vm2319_vm7  ;;  %vm1103_vm7 = vcmp.eq.s32.totalorder %v1850_v39, %v1098_v54  ;;  %vm2495_vm11 = vcmask 1040384  }
 0x182   : > { %vm872_vm0 = vmor %vm616_vm2, %vm2327_vm13  ;;  %vm1104_vm13 = vcmp.eq.s32.totalorder %v1850_v39, %v1102_v38  ;;  %v1495_v40 = vsel %vm1103_vm7, 1.0, %v1664_v56  ;;  %vm2494_vm2 = vcmp.gt.s32.totalorder %v1866_v46, 0 }
 0x183   : > { %vm1491_vm10 = vmpackc.low %vm872_vm0, %vm870_vm4  ;;  %v1496_v43 = vsel %vm1104_vm13, 1.0, %v1664_v56  ;;  %v1109_v47 = vmul.f32 %v1495_v40, %v1834_v0 }
 0x184   : > { %1492 = vmatprep.subr.msk.bf16.mxu0 %vm1491_vm10, %v1665_v8  ;;  %vm1493_vm6 = vmpackc.low %vm615_vm12, %vm613_vm5  ;;  %v1110_v48 = vmul.f32 %v1496_v43, %v1836_v1 }
 0x185   : > { %1494 = vmatpush1.bf16.msk.msra.mxu0 %vm1493_vm6, %v1665_v8  ;;  %v363_v8 = vld [vmem:[%s1828_s15] sm:$0xff]  ;;  %v1111_v57 = vrot.slane %v1109_v47, 4  ;;  %vm2496_vm5 = vmmov %vm2495_vm11 }
 0x186   : > { %v1117_v60 = vrot.slane %v1110_v48, 4  ;;  %vm2497_vm12 = vmmov %vm2496_vm5 }
 0x187   : > { %v1112_v2 = vadd.f32 %v1111_v57, %v1109_v47  ;;  %vm2498_vm4 = vmmov %vm2496_vm5 }
 0x188   : > { %1066 = vmatmul.mubr.bf16.vlgmr.msra.gmra.mrb[0].mxu0 %v1663_v55  ;;  %v421_v53 = vpop.xlane.xlu0 %420  ;;  %v362_v55 = vld [vmem:[%s344_s13] sm:$0xff]  ;;  %v1118_v39 = vadd.f32 %v1117_v60, %v1110_v48 }
 0x189   : > { %1194 = vst [vmem:[%s357_s8] sm:$0x1] %v421_v53  ;;  %v1160_v44 = vsub.f32 %v362_v55, %v363_v8  ;;  %v1113_v4 = vrot.slane %v1112_v2, 2  ;;  %v422_v24 = vmul.f32 3.0, %v421_v53 }
 0x18a   : > { %v1119_v5 = vrot.slane %v1118_v39, 2 }
 0x18b   : > { %v1161_v51 = vand.u32 2147483647, %v1160_v44  ;;  %v1163_v52 = vmul.f32 0.5, %v1160_v44  ;;  %v1114_v56 = vadd.f32 %v1113_v4, %v1112_v2 }
 0x18c   : > { %v1120_v9 = vadd.f32 %v1119_v5, %v1118_v39 }
 0x18d   : > { %v1164_v61 = vmul.f32 %v1163_v52, %v1160_v44  ;;  %v1497_v62 = vadd.f32 -0.5, %v1161_v51  ;;  %vm1162_vm9 = vcmp.lt.f32.partialorder %v1161_v51, 1.0  ;;  %v1115_v13 = vrot.slane %v1114_v56, 1 }
 0x18e   : > { %v1121_v63 = vrot.slane %v1120_v9, 1 }
 0x18f   : > { %v1166_v3 = vsel %vm1162_vm9, %v1164_v61, %v1497_v62  ;;  %v1116_v16 = vadd.f32 %v1115_v13, %v1114_v56 }
 0x190   : > { %v1168_v6 = vcombine.high %v1166_v3, %v1166_v3  ;;  %v1171_v10 = vsel %vm1170_vm3, %v1166_v3, 0.0  ;;  %v1122_v18 = vadd.f32 %v1121_v63, %v1120_v9 }
 0x191   : > { %v1172_v12 = vrot.slane %v1171_v10, 4  ;;  %v1123_v22 = vsub.f32 %v1852_v41, %v1116_v16 }
 0x192   : > { %v1178_v0 = vsel %vm1170_vm3, %v1168_v6, 0.0  ;;  %v1124_v23 = vsub.f32 %v1854_v42, %v1122_v18 }
 0x193   : > { %v1179_v1 = vrot.slane %v1178_v0, 4  ;;  %v1173_v14 = vadd.f32 %v1172_v12, %v1171_v10 }
 0x194   : > { %v1127_v27 = vcombine.low %v1123_v22, %v1124_v23 }
 0x195   : > { %v1180_v15 = vadd.f32 %v1179_v1, %v1178_v0  ;;  %v1174_v19 = vrot.slane %v1173_v14, 2 }
 0x196   : > { %v1134_v41 = vrot.slane %v1127_v27, %v1864_v45 }
 0x197   : > { %v1181_v20 = vrot.slane %v1180_v15, 2  ;;  %v1175_v7 = vadd.f32 %v1174_v19, %v1173_v14 }
 0x198   : > { %v1141_v37 = vrot.slane %v1134_v41, %v1864_v45 }
 0x199   : > { %v1182_v11 = vadd.f32 %v1181_v20, %v1180_v15  ;;  %v1176_v29 = vrot.slane %v1175_v7, 1 }
 0x19b   : > { %v1183_v33 = vrot.slane %v1182_v11, 1  ;;  %v1177_v35 = vadd.f32 %v1176_v29, %v1175_v7 }
 0x19d   : > { %v1184_v36 = vadd.f32 %v1183_v33, %v1182_v11  ;;  %v1185_v53 = vmul.f32 %v1177_v35, %v1922_v58 }
 0x19f   : > { %v1186_v54 = vmul.f32 %v1184_v36, %v1925_v59 }
 0x1a1   : > { %v1188_v44 = vsel %vm2498_vm4, %v1186_v54, 0.0 }
 0x25b   : > { %v1067_v26 = vpop.f32.mrb[0].mxu0 }
 0x25c   : > { %vm1074_vm15 = vcmp.lt.f32.partialorder %v1067_v26, %v422_v24  ;;  %v1069_v28 = vpop.f32.mrb[1].mxu0 }
 0x25d   : > { %v1076_v21 = vsel %vm1074_vm15, 1, %v1666_v17  ;;  %vm1075_vm14 = vcmp.lt.f32.partialorder %v1069_v28, %v422_v24  ;;  %v1071_v30 = vpop.f32.mrb[2].mxu0 }
 0x25e   : > { %v1077_v31 = vsel %vm1075_vm14, 1, %v1666_v17  ;;  %v1072_v25 = vpop.f32.mrb[3].mxu0 }
 0x25f   : > { %v1078_v34 = vcombine.low %v1076_v21, %v1077_v31 }
 0x261   : > { %v1085_v42 = vrot.slane %v1078_v34, %v1864_v45 }
 0x263   : > { %v1092_v32 = vrot.slane %v1085_v42, %v1864_v45  ;;  %v1187_v45 = vsel %vm2497_vm12, %v1185_v53, 0.0 }
 0x264   : > { %v1189_v47 = vadd.f32 %v1188_v44, %v1187_v45 }
 0x265   : > { %vm1093_vm8 = vcmp.ne.s32.totalorder %v1092_v32, 0 }
 0x266   : > { %vm1094_vm1 = vmor %vm2494_vm2, %vm1093_vm8 }
 0x267   : > { %v1143_v38 = vsel %vm1094_vm1, %v1141_v37, 0.0 }
 0x268   : > { %v1148_v55 = vrot.slane %v1143_v38, %v1871_v49  ;;  %v1152_v8 = vrot.slane %v1143_v38, %v1874_v50 }
 0x26a   : > { %v1155_v40 = vsel %vm2495_vm11, %v1148_v55, 0.0  ;;  %v1156_v43 = vsel %vm2496_vm5, %v1152_v8, 0.0 }
 0x26b   : > { %v1157_v46 = vadd.f32 %v1156_v43, %v1155_v40 }
 0x26d   : > { %1158 = vadd.xlane.f32.xlu1 %v1157_v46 }
 0x271   : > { %1190 = vadd.xlane.f32.xlu1 %v1189_v47 }
 0x2fa   : > { %v1159_v58 = vpop.xlane.xlu1 %1158 }
 0x2fb   : > { %1193 = vst [vmem:[%s354_s19] sm:$0x1] %v1159_v58 }
 0x2fe   : > { %v1191_v49 = vpop.xlane.xlu1 %1190 }
 0x2ff   : > { %1192 = vst [vmem:[%s351_s24] sm:$0x1] %v1191_v49 }
 0x300 PF: > { %p20_p8 = scmp.ge.s32.totalorder %s1724_s26, 4   ;;  %s2499_s21 = smov %s1650_s22 }
 0x301   : > { %s2500_s22 = smov %s1654_s23  ;;  %s2501_s23 = smov %s1734_s29 }
 0x302   : > { %s2502_s24 = smov %s1724_s26  ;;  %22 = sbr.rel (!%p20_p8) target bundleno = 5 (0x5), region = 119 }
 0x309   :  { %1236 = vsyncpa [#allocation3], 1 }
 0x30a   :  { %1238 = vsyncpa [#allocation3 + $0x1], 1 }
 0x30b   :  { %1239 = vsyncpa [#allocation5], 1 }
 0x30c   :  { %1241 = vsyncpa [#allocation5 + $0x1], 1 }

</bundles_post_ra>
